<compile_context>
chip_gen: v7x
topology: tpu7x:2x2x1
jax: 0.10.0
libtpu: 0.0.40
codegen_flags: <defaults>
</compile_context>

<pallas_src>
import functools

import numpy as np
import jax
import jax.numpy as jnp
from jax.experimental import pallas as pl
from jax.experimental.pallas import tpu as pltpu


_MIB = 1024 * 1024
_TILE_ALIGN = 128          # multiple of bf16 sublane pack (16) and v5e MXU rows
_DEFAULT_TILE_B = 512


def _round_up(n, m):
    return ((n + m - 1) // m) * m


def _pad2(a, rows, cols):
    r, c = a.shape
    if r == rows and c == cols:
        return a
    return jnp.pad(a, ((0, rows - r), (0, cols - c)))


def _tpu_topology():
    """(vmem_capacity_bytes, tensorcores_per_chip) with conservative fallbacks."""
    vmem_cap = 64 * _MIB     # v7x per-TC VMEM; safe lower bound for v5e/v6e (128 MiB)
    num_tc = 1               # v5e / v6e have a single TensorCore
    try:                     # narrow probe: hardware introspection only, never lowering
        vmem_cap = int(pltpu.get_tpu_info().vmem_capacity_bytes)
    except Exception:
        pass
    try:
        kind = jax.devices()[0].device_kind.lower()
        if "v7" in kind or "7x" in kind:
            num_tc = 2       # v7x: 2 TensorCores per chip
    except Exception:
        pass
    return vmem_cap, num_tc


@functools.lru_cache(maxsize=1)
def _single_buffered_weights_supported():
    """Explicit feature probe (tiny dry compile) for BlockSpec(pipeline_mode=pl.Buffered(1))."""
    if not hasattr(pl, "Buffered"):
        return False

    def _k(w_ref, o_ref):
        o_ref[...] = w_ref[...] * 2.0

    try:
        fn = pl.pallas_call(
            _k,
            out_shape=jax.ShapeDtypeStruct((16, 128), jnp.float32),
            grid=(2,),
            in_specs=[pl.BlockSpec((8, 128), lambda i: (0, 0),
                                   pipeline_mode=pl.Buffered(1))],
            out_specs=pl.BlockSpec((8, 128), lambda i: (i, 0)),
        )
        jax.jit(fn).lower(jnp.zeros((8, 128), jnp.float32)).compile()
        return True
    except Exception:
        return False


def _mlp_kernel(num_layers, compute_dtype, x_ref, *refs):
    """Fused MLP: num_layers x (MXU matmul + f32 bias), ReLU between layers.

    refs = (w1, b1, ..., wL, bL, out). Weights are bf16, biases f32; accumulation f32.
    """
    out_ref = refs[-1]
    # x arrives in its HBM dtype (f32); cast to the MXU dtype on-chip so the wrapper
    # never pays a read-f32/write-bf16/read-bf16 round trip.
    h = x_ref[...].astype(compute_dtype)
    acc = None
    for l in range(num_layers):           # unrolled: each bias broadcast exactly once
        w = refs[2 * l][...]
        b = refs[2 * l + 1][...]          # (1, H) f32
        acc = jnp.dot(h, w, preferred_element_type=jnp.float32) + b
        if l != num_layers - 1:
            h = jnp.maximum(acc, 0.0).astype(compute_dtype)   # ReLU between layers only
    out_ref[...] = acc.astype(out_ref.dtype)


def prepare_mlp_params(params, compute_dtype=jnp.bfloat16):
    """Pad feature dims to multiples of 128 and cast ONCE (outside the hot path).

    params: list of (W, b) with W: (in, out), b: (1, out) or (out,).
    Returns (flat_args, dims, dims_pad).
    """
    dims = [params[0][0].shape[0]] + [w.shape[1] for (w, _) in params]
    dims_pad = [_round_up(d, 128) for d in dims]
    flat = []
    for l, (w, b) in enumerate(params):
        w = jnp.asarray(w)
        b = jnp.asarray(b).reshape(1, -1)
        flat.append(_pad2(w, dims_pad[l], dims_pad[l + 1]).astype(compute_dtype))
        flat.append(_pad2(b, 1, dims_pad[l + 1]).astype(jnp.float32))
    return flat, tuple(dims), tuple(dims_pad)


def _weights_bytes(dims_pad, compute_bytes):
    return sum(di * do * compute_bytes + do * 4
               for di, do in zip(dims_pad[:-1], dims_pad[1:]))


def _vmem_estimate(tile_b, dims_pad, in_bytes, compute_bytes, out_bytes, w_bufs):
    est = 2 * tile_b * dims_pad[0] * in_bytes             # x tile (double-buffered, f32)
    est += 2 * tile_b * dims_pad[-1] * out_bytes          # out tile (double-buffered)
    est += tile_b * max(dims_pad) * (4 + compute_bytes)   # live f32 acc + bf16 h intermediates
    est += _weights_bytes(dims_pad, compute_bytes) * w_bufs
    return est


def _build_call(num_layers, compute_dtype, tile_b, batch, dims_pad, out_dtype,
                single_buffer_weights, vmem_limit):
    def const_spec(shape):
        if single_buffer_weights:
            # Constant index map: the block never changes across grid steps, so a single
            # VMEM buffer suffices (halves the resident-weight footprint vs default 2).
            return pl.BlockSpec(shape, lambda i: (0, 0), pipeline_mode=pl.Buffered(1))
        return pl.BlockSpec(shape, lambda i: (0, 0))

    in_specs = [pl.BlockSpec((tile_b, dims_pad[0]), lambda i: (i, 0))]
    for di, do in zip(dims_pad[:-1], dims_pad[1:]):
        in_specs.append(const_spec((di, do)))
        in_specs.append(const_spec((1, do)))

    compute_bytes = np.dtype(compute_dtype).itemsize
    out_bytes = np.dtype(out_dtype).itemsize
    flops = 2 * batch * sum(di * do for di, do in zip(dims_pad[:-1], dims_pad[1:]))
    bytes_accessed = (batch * dims_pad[0] * 4
                      + batch * dims_pad[-1] * out_bytes
                      + _weights_bytes(dims_pad, compute_bytes))

    return pl.pallas_call(
        functools.partial(_mlp_kernel, num_layers, compute_dtype),
        out_shape=jax.ShapeDtypeStruct((batch, dims_pad[-1]), out_dtype),
        grid=(pl.cdiv(batch, tile_b),),
        in_specs=in_specs,
        out_specs=pl.BlockSpec((tile_b, dims_pad[-1]), lambda i: (i, 0)),
        compiler_params=pltpu.CompilerParams(
            dimension_semantics=("parallel",),
            vmem_limit_bytes=vmem_limit,
        ),
        cost_estimate=pl.CostEstimate(
            flops=flops, transcendentals=0, bytes_accessed=bytes_accessed),
    )


def simsiam_forward(x, params=None, *, tile_b=_DEFAULT_TILE_B,
                    compute_dtype=jnp.bfloat16, out_dtype=jnp.bfloat16, prepared=None):
    """Pallas implementation of SimSiam.forward (the torso MLP).

    x:        (B, input_size) float32 — kept f32 in HBM, cast to bf16 on-chip.
    params:   list of (W, b) with W: (in, out), b: (1, out); ignored if `prepared` given.
    prepared: optional output of prepare_mlp_params(params, compute_dtype) so repeated
              calls never re-pad/re-cast the weights (hot-path optimization).
    """
    B, D_in = x.shape
    if prepared is None:
        prepared = prepare_mlp_params(params, compute_dtype)
    flat_params, dims, dims_pad = prepared
    num_layers = len(flat_params) // 2
    assert dims[0] == D_in

    vmem_cap, num_tc = _tpu_topology()
    single_buf = _single_buffered_weights_supported()
    w_bufs = 1 if single_buf else 2

    in_bytes = np.dtype(x.dtype).itemsize
    compute_bytes = np.dtype(compute_dtype).itemsize
    out_bytes = np.dtype(out_dtype).itemsize

    # Generation-aware VMEM budget (~70% of per-core capacity: ~45 MiB v7x, ~90 MiB v5e/v6e).
    vmem_budget = int(0.70 * vmem_cap)
    if _weights_bytes(dims_pad, compute_bytes) * w_bufs > vmem_budget:
        # TODO(synk): tile the hidden K/N dims (inner pltpu.emit_pipeline with an f32 VMEM
        # accumulator) when the resident padded weights alone exceed VMEM (very wide MLPs,
        # critical on v7x's 64 MiB). Until then, fail loudly rather than silently degrade.
        raise NotImplementedError(
            "resident MLP weights exceed the VMEM budget; hidden-dim tiling not implemented")

    # Batch tiling: MXU/sublane-aligned tiles (multiple of 128 rows), single maximal tile
    # on 1-TC chips, even 2-way split only on v7x, halving (still 128-aligned) to fit VMEM.
    tile_b = _round_up(min(tile_b, _round_up(B, _TILE_ALIGN)), _TILE_ALIGN)
    while (tile_b > _TILE_ALIGN and
           _vmem_estimate(tile_b, dims_pad, in_bytes, compute_bytes, out_bytes,
                          w_bufs) > vmem_budget):
        tile_b = max(_TILE_ALIGN, _round_up(tile_b // 2, _TILE_ALIGN))
    if num_tc >= 2 and B > _TILE_ALIGN and pl.cdiv(B, tile_b) < 2:
        # v7x: give each TensorCore one (even) share of the batch.
        tile_b = _round_up(pl.cdiv(B, 2), _TILE_ALIGN)

    est = _vmem_estimate(tile_b, dims_pad, in_bytes, compute_bytes, out_bytes, w_bufs)
    vmem_limit = int(min(max(2 * est, 32 * _MIB), int(0.85 * vmem_cap)))

    # Zero-pad ONLY the feature dim of x (exact zeros feed the K contraction); the batch
    # dim is not padded — the partial tail block's out-of-range rows are masked on writeback.
    x_in = _pad2(x, B, dims_pad[0]) if D_in != dims_pad[0] else x

    out = _build_call(num_layers, compute_dtype, tile_b, B, dims_pad, out_dtype,
                      single_buf, vmem_limit)(x_in, *flat_params)

    H = dims[-1]
    return out if H == dims_pad[-1] else out[:, :H]


def init_mlp_params(key, input_size, hidden_size, num_layers):
    """Deterministic init mimicking PyTorch nn.Linear default (U(-k, k), k=1/sqrt(fan_in))."""
    params = []
    in_dim = input_size
    for _ in range(num_layers):
        key, kw, kb = jax.random.split(key, 3)
        k = 1.0 / jnp.sqrt(jnp.float32(in_dim))
        w = jax.random.uniform(kw, (in_dim, hidden_size), jnp.float32, -k, k)
        b = jax.random.uniform(kb, (1, hidden_size), jnp.float32, -k, k)
        params.append((w, b))
        in_dim = hidden_size
    return params, key


def reference_forward(x, params, compute_dtype=jnp.bfloat16, out_dtype=jnp.bfloat16):
    """Plain-JAX reference with identical bf16-in / f32-accumulate / bf16-out semantics."""
    num_layers = len(params)
    h = x.astype(compute_dtype)
    acc = None
    for l, (w, b) in enumerate(params):
        acc = jnp.dot(h, w.astype(compute_dtype),
                      preferred_element_type=jnp.float32) + b.reshape(1, -1)
        if l != num_layers - 1:
            h = jnp.maximum(acc, 0.0).astype(compute_dtype)
    return acc.astype(out_dtype)


if __name__ == "__main__":
    # Small, deliberately non-aligned shapes: exercise lane padding (20 -> 128, 96 -> 128)
    # and the un-padded-batch partial tail block (B=40 handled inside one 128-row tile).
    input_size = 20
    hidden_size = 96
    num_layers = 4
    batch = 40

    key = jax.random.PRNGKey(0)
    key, kx = jax.random.split(key)
    x = jax.random.normal(kx, (batch, input_size), jnp.float32)

    torso_params, key = init_mlp_params(key, input_size, hidden_size, num_layers)
    # SimSiam also builds `proj = make_mlp(hidden, hidden, num_layers)`, but forward()
    # only uses the torso; proj params are initialized for fidelity and left unused.
    proj_params, key = init_mlp_params(key, hidden_size, hidden_size, num_layers)

    prepared = prepare_mlp_params(torso_params)   # pad + cast weights once (not per call)
    out = simsiam_forward(x, torso_params, prepared=prepared)
    out = jax.block_until_ready(out)

    ref = reference_forward(x, torso_params)
    assert out.shape == (batch, hidden_size)
    err = float(jnp.max(jnp.abs(out.astype(jnp.float32) - ref.astype(jnp.float32))))
    assert err < 3e-2, f"max abs err {err}"

    print("KERNEL_OK")
</pallas_src>

<mosaic_0001>
module attributes {stable_mosaic.version = 11 : i64} {
  func.func @_mlp_kernel(%arg0: i32, %arg1: memref<128x128xf32, #tpu.memory_space<vmem>>, %arg2: memref<128x128xbf16, #tpu.memory_space<vmem>>, %arg3: memref<1x128xf32, #tpu.memory_space<vmem>>, %arg4: memref<128x128xbf16, #tpu.memory_space<vmem>>, %arg5: memref<1x128xf32, #tpu.memory_space<vmem>>, %arg6: memref<128x128xbf16, #tpu.memory_space<vmem>>, %arg7: memref<1x128xf32, #tpu.memory_space<vmem>>, %arg8: memref<128x128xbf16, #tpu.memory_space<vmem>>, %arg9: memref<1x128xf32, #tpu.memory_space<vmem>>, %arg10: memref<128x128xbf16, #tpu.memory_space<vmem>>) attributes {dimension_semantics = [#tpu.dimension_semantics<parallel>], iteration_bounds = array<i64: 1>, scalar_prefetch = 0 : i64, scratch_operands = 0 : i64, tpu.core_type = #tpu.core_type<tc>, window_params = [{transform_indices = @transform_0, window_bounds = array<i64: 128, 128>}, {pipeline_mode = #tpu.pipeline_mode<synchronous>, transform_indices = @transform_1, window_bounds = array<i64: 128, 128>}, {pipeline_mode = #tpu.pipeline_mode<synchronous>, transform_indices = @transform_2, window_bounds = array<i64: 1, 128>}, {pipeline_mode = #tpu.pipeline_mode<synchronous>, transform_indices = @transform_3, window_bounds = array<i64: 128, 128>}, {pipeline_mode = #tpu.pipeline_mode<synchronous>, transform_indices = @transform_4, window_bounds = array<i64: 1, 128>}, {pipeline_mode = #tpu.pipeline_mode<synchronous>, transform_indices = @transform_5, window_bounds = array<i64: 128, 128>}, {pipeline_mode = #tpu.pipeline_mode<synchronous>, transform_indices = @transform_6, window_bounds = array<i64: 1, 128>}, {pipeline_mode = #tpu.pipeline_mode<synchronous>, transform_indices = @transform_7, window_bounds = array<i64: 128, 128>}, {pipeline_mode = #tpu.pipeline_mode<synchronous>, transform_indices = @transform_8, window_bounds = array<i64: 1, 128>}, {transform_indices = @transform_9, window_bounds = array<i64: 128, 128>}]} {
    %c0 = arith.constant 0 : index
    %c0_0 = arith.constant 0 : index
    %0 = vector.load %arg1[%c0, %c0_0] : memref<128x128xf32, #tpu.memory_space<vmem>>, vector<128x128xf32>
    %1 = arith.truncf %0 : vector<128x128xf32> to vector<128x128xbf16>
    %c0_1 = arith.constant 0 : index
    %c0_2 = arith.constant 0 : index
    %2 = vector.load %arg2[%c0_1, %c0_2] : memref<128x128xbf16, #tpu.memory_space<vmem>>, vector<128x128xbf16>
    %c0_3 = arith.constant 0 : index
    %c0_4 = arith.constant 0 : index
    %3 = vector.load %arg3[%c0_3, %c0_4] : memref<1x128xf32, #tpu.memory_space<vmem>>, vector<1x128xf32>
    %cst = arith.constant dense<0.000000e+00> : vector<128x128xf32>
    %4 = tpu.matmul %1, %2, %cst {dimension_numbers = #tpu.dot_dimension_numbers<[1], [0], [0], [1], [0, 0, 1, 1], [], []>} : vector<128x128xbf16>, vector<128x128xbf16>, vector<128x128xf32> -> vector<128x128xf32>
    %5 = vector.broadcast %3 : vector<1x128xf32> to vector<128x128xf32>
    %6 = arith.addf %4, %5 : vector<128x128xf32>
    %cst_5 = arith.constant 0.000000e+00 : f32
    %7 = vector.broadcast %cst_5 : f32 to vector<128x128xf32>
    %8 = arith.maximumf %6, %7 : vector<128x128xf32>
    %9 = arith.truncf %8 : vector<128x128xf32> to vector<128x128xbf16>
    %c0_6 = arith.constant 0 : index
    %c0_7 = arith.constant 0 : index
    %10 = vector.load %arg4[%c0_6, %c0_7] : memref<128x128xbf16, #tpu.memory_space<vmem>>, vector<128x128xbf16>
    %c0_8 = arith.constant 0 : index
    %c0_9 = arith.constant 0 : index
    %11 = vector.load %arg5[%c0_8, %c0_9] : memref<1x128xf32, #tpu.memory_space<vmem>>, vector<1x128xf32>
    %cst_10 = arith.constant dense<0.000000e+00> : vector<128x128xf32>
    %12 = tpu.matmul %9, %10, %cst_10 {dimension_numbers = #tpu.dot_dimension_numbers<[1], [0], [0], [1], [0, 0, 1, 1], [], []>} : vector<128x128xbf16>, vector<128x128xbf16>, vector<128x128xf32> -> vector<128x128xf32>
    %13 = vector.broadcast %11 : vector<1x128xf32> to vector<128x128xf32>
    %14 = arith.addf %12, %13 : vector<128x128xf32>
    %cst_11 = arith.constant 0.000000e+00 : f32
    %15 = vector.broadcast %cst_11 : f32 to vector<128x128xf32>
    %16 = arith.maximumf %14, %15 : vector<128x128xf32>
    %17 = arith.truncf %16 : vector<128x128xf32> to vector<128x128xbf16>
    %c0_12 = arith.constant 0 : index
    %c0_13 = arith.constant 0 : index
    %18 = vector.load %arg6[%c0_12, %c0_13] : memref<128x128xbf16, #tpu.memory_space<vmem>>, vector<128x128xbf16>
    %c0_14 = arith.constant 0 : index
    %c0_15 = arith.constant 0 : index
    %19 = vector.load %arg7[%c0_14, %c0_15] : memref<1x128xf32, #tpu.memory_space<vmem>>, vector<1x128xf32>
    %cst_16 = arith.constant dense<0.000000e+00> : vector<128x128xf32>
    %20 = tpu.matmul %17, %18, %cst_16 {dimension_numbers = #tpu.dot_dimension_numbers<[1], [0], [0], [1], [0, 0, 1, 1], [], []>} : vector<128x128xbf16>, vector<128x128xbf16>, vector<128x128xf32> -> vector<128x128xf32>
    %21 = vector.broadcast %19 : vector<1x128xf32> to vector<128x128xf32>
    %22 = arith.addf %20, %21 : vector<128x128xf32>
    %cst_17 = arith.constant 0.000000e+00 : f32
    %23 = vector.broadcast %cst_17 : f32 to vector<128x128xf32>
    %24 = arith.maximumf %22, %23 : vector<128x128xf32>
    %25 = arith.truncf %24 : vector<128x128xf32> to vector<128x128xbf16>
    %c0_18 = arith.constant 0 : index
    %c0_19 = arith.constant 0 : index
    %26 = vector.load %arg8[%c0_18, %c0_19] : memref<128x128xbf16, #tpu.memory_space<vmem>>, vector<128x128xbf16>
    %c0_20 = arith.constant 0 : index
    %c0_21 = arith.constant 0 : index
    %27 = vector.load %arg9[%c0_20, %c0_21] : memref<1x128xf32, #tpu.memory_space<vmem>>, vector<1x128xf32>
    %cst_22 = arith.constant dense<0.000000e+00> : vector<128x128xf32>
    %28 = tpu.matmul %25, %26, %cst_22 {dimension_numbers = #tpu.dot_dimension_numbers<[1], [0], [0], [1], [0, 0, 1, 1], [], []>} : vector<128x128xbf16>, vector<128x128xbf16>, vector<128x128xf32> -> vector<128x128xf32>
    %29 = vector.broadcast %27 : vector<1x128xf32> to vector<128x128xf32>
    %30 = arith.addf %28, %29 : vector<128x128xf32>
    %31 = arith.truncf %30 : vector<128x128xf32> to vector<128x128xbf16>
    %c0_23 = arith.constant 0 : index
    %c0_24 = arith.constant 0 : index
    %32 = vector.load %arg10[%c0_23, %c0_24] : memref<128x128xbf16, #tpu.memory_space<vmem>>, vector<128x128xbf16>
    tpu.vector_store %arg10[%c0_23, %c0_24], %31 {strides = array<i32>} : memref<128x128xbf16, #tpu.memory_space<vmem>>, vector<128x128xbf16>,
    return
  }
  func.func @transform_0(%arg0: i32) -> (i32, i32) {
    %c0_i32 = arith.constant 0 : i32
    %c0_i32_0 = arith.constant 0 : i32
    return %arg0, %c0_i32 : i32, i32
  }
  func.func @transform_1(%arg0: i32) -> (i32, i32) {
    %c0_i32 = arith.constant 0 : i32
    %c0_i32_0 = arith.constant 0 : i32
    %c0_i32_1 = arith.constant 0 : i32
    return %c0_i32, %c0_i32_0 : i32, i32
  }
  func.func @transform_2(%arg0: i32) -> (i32, i32) {
    %c0_i32 = arith.constant 0 : i32
    %c0_i32_0 = arith.constant 0 : i32
    %c0_i32_1 = arith.constant 0 : i32
    return %c0_i32, %c0_i32_0 : i32, i32
  }
  func.func @transform_3(%arg0: i32) -> (i32, i32) {
    %c0_i32 = arith.constant 0 : i32
    %c0_i32_0 = arith.constant 0 : i32
    %c0_i32_1 = arith.constant 0 : i32
    return %c0_i32, %c0_i32_0 : i32, i32
  }
  func.func @transform_4(%arg0: i32) -> (i32, i32) {
    %c0_i32 = arith.constant 0 : i32
    %c0_i32_0 = arith.constant 0 : i32
    %c0_i32_1 = arith.constant 0 : i32
    return %c0_i32, %c0_i32_0 : i32, i32
  }
  func.func @transform_5(%arg0: i32) -> (i32, i32) {
    %c0_i32 = arith.constant 0 : i32
    %c0_i32_0 = arith.constant 0 : i32
    %c0_i32_1 = arith.constant 0 : i32
    return %c0_i32, %c0_i32_0 : i32, i32
  }
  func.func @transform_6(%arg0: i32) -> (i32, i32) {
    %c0_i32 = arith.constant 0 : i32
    %c0_i32_0 = arith.constant 0 : i32
    %c0_i32_1 = arith.constant 0 : i32
    return %c0_i32, %c0_i32_0 : i32, i32
  }
  func.func @transform_7(%arg0: i32) -> (i32, i32) {
    %c0_i32 = arith.constant 0 : i32
    %c0_i32_0 = arith.constant 0 : i32
    %c0_i32_1 = arith.constant 0 : i32
    return %c0_i32, %c0_i32_0 : i32, i32
  }
  func.func @transform_8(%arg0: i32) -> (i32, i32) {
    %c0_i32 = arith.constant 0 : i32
    %c0_i32_0 = arith.constant 0 : i32
    %c0_i32_1 = arith.constant 0 : i32
    return %c0_i32, %c0_i32_0 : i32, i32
  }
  func.func @transform_9(%arg0: i32) -> (i32, i32) {
    %c0_i32 = arith.constant 0 : i32
    %c0_i32_0 = arith.constant 0 : i32
    return %arg0, %c0_i32 : i32, i32
  }
}

</mosaic_0001>

<bundles_post_ra>
// kernel: tpu_custom_call.1
= control target key start
LH: loop header
LB: loop body
LE: loop exit
PB: predicated region body
PF: predicated region fallthrough
CT: control target
= control target key end

     0   :  { %14 = vsyncpa [#allocation3], 0  ;;  %s1617_s0 = inlined_call_operand.hbm [shape: f32[40,128], index: 0, kind: input, shape index: {}]   ;;  %s1618_s1 = inlined_call_operand.hbm [shape: bf16[128,128], index: 1, kind: input, shape index: {}]   ;;  %s1619_s2 = inlined_call_operand.vmem [shape: f32[1,128], index: 2, kind: input, shape index: {}]   ;;  %s1620_s3 = inlined_call_operand.hbm [shape: bf16[128,128], index: 3, kind: input, shape index: {}]   ;;  %s1621_s4 = inlined_call_operand.vmem [shape: f32[1,128], index: 4, kind: input, shape index: {}]   ;;  %s1622_s5 = inlined_call_operand.hbm [shape: bf16[128,128], index: 5, kind: input, shape index: {}]   ;;  %s1623_s6 = inlined_call_operand.vmem [shape: f32[1,128], index: 6, kind: input, shape index: {}]   ;;  %s1624_s7 = inlined_call_operand.hbm [shape: bf16[128,128], index: 7, kind: input, shape index: {}]   ;;  %s1625_s8 = inlined_call_operand.vmem [shape: f32[1,128], index: 8, kind: input, shape index: {}]   ;;  %s1626_s9 = inlined_call_operand.hbm [shape: bf16[40,128], index: 9, kind: output, shape index: {}]  }
   0x1   :  { %15 = vsyncpa [#allocation6], 0 }
   0x2   :  { %16 = vsyncpa [#allocation9], 0 }
   0x3   :  { %17 = vsyncpa [#allocation4], 0 }
   0x4   :  { %22 = vsyncadd [#allocation3], 1408  ;;  %s1458_s30 = smov [#allocation5]   ;;  %s1318_s13 = scalar_lea.hbm %s1618_s1, 1024 }
   0x5   :  { %s35_s10 = sshll.u32 %s1458_s30, 4  ;;  %p1319_p0 = scmp.ne.s32.totalorder %s1618_s1, %s1318_s13  ;;  %s36_s10 = int_to_ptr.vmem [resolvable:$true] %s35_s10 }
   0x6   :  { %p1322_p1 = scmp.lt.u32.totalorder %s1318_s13, %s1618_s1 }
   0x8   :  { %p1324_p2 = pnand %p1322_p1, %p1319_p0 }
   0xa   :  { %1327 = shalt.err (!%p1324_p2)
}
   0xb   :  { %s1328_s18 = scalar_lea.vmem %s36_s10, 1024  ;;  %p1333_p4 = scmp.lt.s32.totalorder %s36_s10, %s36_s10 }
   0xc   :  { %p1329_p3 = scmp.ne.s32.totalorder %s36_s10, %s1328_s18  ;;  %p1334_p5 = scmp.lt.s32.totalorder %s1328_s18, %s1328_s18 }
   0xe   :  { %p1335_p6 = por %p1334_p5, %p1333_p4 }
  0x10   :  { %p1336_p7 = pnand %p1335_p6, %p1329_p3 }
  0x12   :  { %1339 = shalt.err (!%p1336_p7)
}
  0x13   :  { %s1459_s19 = smov 64   ;;  %s1460_s20 = smov 4  }
  0x14   :  { %41 = dma.hbm_to_vmem [thread:$0]  %s1618_s1, 1024, %s36_s10, [#allocation6], %s1459_s19, %s1459_s19, %s1460_s20  }
  0x15   :  { %s1461_s23 = smov [#allocation8]   ;;  %s1462_s25 = smov [#allocation2]  }
  0x16   :  { %s63_s24 = sshll.u32 %s1461_s23, 4  ;;  %s23_s26 = sshll.u32 %s1462_s25, 4  ;;  %s64_s24 = int_to_ptr.vmem [resolvable:$true] %s63_s24  ;;  %s24_s26 = int_to_ptr.vmem [resolvable:$true] %s23_s26 }
  0x17   :  { %s1340_s29 = scalar_lea.hbm %s1622_s5, 1024 }
  0x18   :  { %p1341_p8 = scmp.ne.s32.totalorder %s1622_s5, %s1340_s29  ;;  %p1344_p9 = scmp.lt.u32.totalorder %s1340_s29, %s1622_s5 }
  0x1a   :  { %p1346_p10 = pnand %p1344_p9, %p1341_p8 }
  0x1c   :  { %1349 = shalt.err (!%p1346_p10)
}
  0x1d   :  { %s1350_s1 = scalar_lea.vmem %s64_s24, 1024  ;;  %p1355_p12 = scmp.lt.s32.totalorder %s64_s24, %s64_s24 }
  0x1e   :  { %p1351_p11 = scmp.ne.s32.totalorder %s64_s24, %s1350_s1  ;;  %p1356_p13 = scmp.lt.s32.totalorder %s1350_s1, %s1350_s1 }
  0x20   :  { %p1357_p0 = por %p1356_p13, %p1355_p12 }
  0x22   :  { %p1358_p1 = pnand %p1357_p0, %p1351_p11 }
  0x24   :  { %1361 = shalt.err (!%p1358_p1)
}
  0x25   :  { %69 = dma.hbm_to_vmem [thread:$0]  %s1622_s5, 1024, %s64_s24, [#allocation9], %s1459_s19, %s1459_s19, %s1460_s20  }
  0x26   :  { %s1362_s17 = scalar_lea.hbm %s1617_s0, 640 }
  0x27   :  { %p1363_p2 = scmp.ne.s32.totalorder %s1617_s0, %s1362_s17  ;;  %p1366_p3 = scmp.lt.u32.totalorder %s1362_s17, %s1617_s0 }
  0x29   :  { %p1368_p4 = pnand %p1366_p3, %p1363_p2 }
  0x2b   :  { %1371 = shalt.err (!%p1368_p4)
}
  0x2c   :  { %s1372_s25 = scalar_lea.vmem %s24_s26, 640  ;;  %s1376_s27 = scalar_lea.vmem %s24_s26, 2048 }
  0x2d   :  { %p1373_p5 = scmp.ne.s32.totalorder %s24_s26, %s1372_s25  ;;  %p1377_p6 = scmp.lt.s32.totalorder %s24_s26, %s24_s26 }
  0x2e   :  { %p1378_p7 = scmp.lt.s32.totalorder %s1376_s27, %s1372_s25 }
  0x30   :  { %p1379_p8 = por %p1378_p7, %p1377_p6 }
  0x32   :  { %p1380_p9 = pnand %p1379_p8, %p1373_p5 }
  0x34   :  { %1383 = shalt.err (!%p1380_p9)
}
  0x35   :  { %s1463_s5 = smov 128   ;;  %s1464_s24 = smov 8  }
  0x36   :  { %29 = dma.hbm_to_vmem [thread:$0]  %s1617_s0, 640, %s24_s26, [#allocation3], %s1463_s5, %s1463_s5, %s1464_s24  }
  0x37   :  { %s1465_s30 = smov [#allocation7]   ;;  %s1466_s12 = smov [#allocation10]  }
  0x38   :  { %s49_s11 = sshll.u32 %s1465_s30, 4  ;;  %s77_s13 = sshll.u32 %s1466_s12, 4  ;;  %s50_s11 = int_to_ptr.vmem [resolvable:$true] %s49_s11  ;;  %s78_s13 = int_to_ptr.vmem [resolvable:$true] %s77_s13 }
  0x39   :  { %s1384_s14 = scalar_lea.hbm %s1620_s3, 1024 }
  0x3a   :  { %p1385_p10 = scmp.ne.s32.totalorder %s1620_s3, %s1384_s14  ;;  %p1388_p11 = scmp.lt.u32.totalorder %s1384_s14, %s1620_s3 }
  0x3c   :  { %p1390_p12 = pnand %p1388_p11, %p1385_p10 }
  0x3e   :  { %1393 = shalt.err (!%p1390_p12)
}
  0x3f   :  { %s1394_s0 = scalar_lea.vmem %s50_s11, 1024  ;;  %p1399_p0 = scmp.lt.s32.totalorder %s50_s11, %s50_s11 }
  0x40   :  { %p1395_p13 = scmp.ne.s32.totalorder %s50_s11, %s1394_s0  ;;  %p1400_p1 = scmp.lt.s32.totalorder %s1394_s0, %s1394_s0 }
  0x42   :  { %p1401_p2 = por %p1400_p1, %p1399_p0 }
  0x44   :  { %p1402_p3 = pnand %p1401_p2, %p1395_p13 }
  0x46   :  { %1405 = shalt.err (!%p1402_p3)
}
  0x47   :  { %55 = dma.hbm_to_vmem [thread:$0]  %s1620_s3, 1024, %s50_s11, [#allocation6], %s1459_s19, %s1459_s19, %s1460_s20  }
  0x48   :  { %s1406_s25 = scalar_lea.hbm %s1624_s7, 1024 }
  0x49   :  { %p1407_p4 = scmp.ne.s32.totalorder %s1624_s7, %s1406_s25  ;;  %p1410_p5 = scmp.lt.u32.totalorder %s1406_s25, %s1624_s7 }
  0x4b   :  { %p1412_p6 = pnand %p1410_p5, %p1407_p4 }
  0x4d   :  { %1415 = shalt.err (!%p1412_p6)
}
  0x4e   :  { %s1416_s29 = scalar_lea.vmem %s78_s13, 1024  ;;  %p1421_p8 = scmp.lt.s32.totalorder %s78_s13, %s78_s13 }
  0x4f   :  { %p1417_p7 = scmp.ne.s32.totalorder %s78_s13, %s1416_s29  ;;  %p1422_p9 = scmp.lt.s32.totalorder %s1416_s29, %s1416_s29 }
  0x51   :  { %p1423_p10 = por %p1422_p9, %p1421_p8 }
  0x53   :  { %p1424_p11 = pnand %p1423_p10, %p1417_p7 }
  0x55   :  { %1427 = shalt.err (!%p1424_p11)
}
  0x56   :  { %83 = dma.hbm_to_vmem [thread:$0]  %s1624_s7, 1024, %s78_s13, [#allocation9], %s1459_s19, %s1459_s19, %s1460_s20  }
  0x57   :  { %1450 = dma.done.wait [#allocation3], 2048  }
  0x58   :  { %1451 = vsyncadd [#allocation3], 4294965248 }
  0x59   :  { %1452 = dma.done.wait [#allocation6], 2048  }
  0x5a   :  { %1453 = vsyncadd [#allocation6], 4294965248 }
  0x5b   :  { %1454 = dma.done.wait [#allocation9], 2048  }
  0x5c   :  { %1455 = vsyncadd [#allocation9], 4294965248  ;;  %v1286_v0 = vld [vmem:[#allocation5] sm:$0xff]   ;;  %v1287_v1 = vld [vmem:[#allocation5 + $0x8] sm:$0xff]  }
  0x5d   :  { %1148 = vmatprep.subr.bf16.mxu0 %v1286_v0  ;;  %v1288_v2 = vld [vmem:[#allocation5 + $0x10] sm:$0xff]   ;;  %v1289_v3 = vld [vmem:[#allocation5 + $0x18] sm:$0xff]   ;;  %v102_v4 = vld [vmem:[#allocation2] sm:$0xff] }
  0x5e   :  { %1149 = vmatpush3.bf16.msra.mxu0 %v1286_v0  ;;  %v103_v5 = vld [vmem:[#allocation2 + $0x8] sm:$0xff]  ;;  %v1290_v7 = vld [vmem:[#allocation5 + $0x20] sm:$0xff]   ;;  %v1296_v11 = vld [vmem:[#allocation7 + $0x10] sm:$0xff]  }
  0x5f   :  { %1150 = vmatprep.subr.bf16.mxu0 %v1287_v1  ;;  %v118_v6 = vpack.c.bf16 %v103_v5, %v102_v4  ;;  %v1294_v8 = vld [vmem:[#allocation7] sm:$0xff]   ;;  %v1295_v9 = vld [vmem:[#allocation7 + $0x8] sm:$0xff]   ;;  %v1292_v12 = vld [vmem:[#allocation5 + $0x30] sm:$0xff]  }
  0x60   :  { %v1291_v10 = vld [vmem:[#allocation5 + $0x28] sm:$0xff]   ;;  %1180 = vmatprep.subr.bf16.mxu1 %v1294_v8  ;;  %v1297_v13 = vld [vmem:[#allocation7 + $0x18] sm:$0xff]   ;;  %v1298_v15 = vld [vmem:[#allocation7 + $0x20] sm:$0xff]  }
  0x61   :  { %1164 = vmatprep.mubr.bf16.mxu0 %v118_v6  ;;  %1181 = vmatpush3.bf16.msra.mxu1 %v1294_v8  ;;  %v1293_v14 = vld [vmem:[#allocation5 + $0x38] sm:$0xff]   ;;  %v104_v16 = vld [vmem:[#allocation2 + $0x10] sm:$0xff]  ;;  %v106_v18 = vld [vmem:[#allocation2 + $0x20] sm:$0xff] }
  0x62   :  { %1151 = vmatpush3.bf16.msra.mxu0 %v1287_v1  ;;  %1182 = vmatprep.subr.bf16.mxu1 %v1295_v9  ;;  %v105_v17 = vld [vmem:[#allocation2 + $0x18] sm:$0xff]  ;;  %v107_v19 = vld [vmem:[#allocation2 + $0x28] sm:$0xff]  ;;  %v108_v23 = vld [vmem:[#allocation2 + $0x30] sm:$0xff] }
  0x63   :  { %1152 = vmatprep.subr.bf16.mxu0 %v1288_v2  ;;  %v1299_v20 = vld [vmem:[#allocation7 + $0x28] sm:$0xff]   ;;  %v119_v21 = vpack.c.bf16 %v105_v17, %v104_v16  ;;  %v120_v22 = vpack.c.bf16 %v107_v19, %v106_v18  ;;  %v109_v24 = vld [vmem:[#allocation2 + $0x38] sm:$0xff]  ;;  %v110_v25 = vld [vmem:[#allocation2 + $0x40] sm:$0xff] }
  0x64   :  { %v111_v26 = vld [vmem:[#allocation2 + $0x48] sm:$0xff]  ;;  %v121_v27 = vpack.c.bf16 %v109_v24, %v108_v23  ;;  %v112_v29 = vld [vmem:[#allocation2 + $0x50] sm:$0xff]  ;;  %v113_v30 = vld [vmem:[#allocation2 + $0x58] sm:$0xff] }
  0x65   :  { %1183 = vmatpush3.bf16.msra.mxu1 %v1295_v9  ;;  %v122_v28 = vpack.c.bf16 %v111_v26, %v110_v25  ;;  %v114_v31 = vld [vmem:[#allocation2 + $0x60] sm:$0xff]  ;;  %v115_v32 = vld [vmem:[#allocation2 + $0x68] sm:$0xff]  ;;  %v123_v33 = vpack.c.bf16 %v113_v30, %v112_v29  ;;  %v116_v35 = vld [vmem:[#allocation2 + $0x70] sm:$0xff] }
  0x66   :  { %1153 = vmatpush3.bf16.msra.mxu0 %v1288_v2  ;;  %1184 = vmatprep.subr.bf16.mxu1 %v1296_v11  ;;  %v124_v34 = vpack.c.bf16 %v115_v32, %v114_v31  ;;  %v117_v36 = vld [vmem:[#allocation2 + $0x78] sm:$0xff]  ;;  %v1300_v38 = vld [vmem:[#allocation7 + $0x30] sm:$0xff]   ;;  %v1302_v40 = vld [vmem:[#allocation8] sm:$0xff]  }
  0x67   :  { %1154 = vmatprep.subr.bf16.mxu0 %v1289_v3  ;;  %v125_v37 = vpack.c.bf16 %v117_v36, %v116_v35  ;;  %v1301_v39 = vld [vmem:[#allocation7 + $0x38] sm:$0xff]   ;;  %v1303_v41 = vld [vmem:[#allocation8 + $0x8] sm:$0xff]   ;;  %v1304_v42 = vld [vmem:[#allocation8 + $0x10] sm:$0xff]  }
  0x68   :  { %v1305_v43 = vld [vmem:[#allocation8 + $0x18] sm:$0xff]   ;;  %v1306_v44 = vld [vmem:[#allocation8 + $0x20] sm:$0xff]   ;;  %v1307_v45 = vld [vmem:[#allocation8 + $0x28] sm:$0xff]  }
  0x69   :  { %1185 = vmatpush3.bf16.msra.mxu1 %v1296_v11  ;;  %v969_v46 = vld [vmem:[%s1619_s2] ss:$0 sm:$0xff] }
  0x6a   :  { %1155 = vmatpush3.bf16.msra.mxu0 %v1289_v3  ;;  %1186 = vmatprep.subr.bf16.mxu1 %v1297_v13 }
  0x6b   :  { %1156 = vmatprep.subr.bf16.mxu0 %v1290_v7 }
  0x6d   :  { %1187 = vmatpush3.bf16.msra.mxu1 %v1297_v13 }
  0x6e   :  { %1157 = vmatpush3.bf16.msra.mxu0 %v1290_v7  ;;  %1188 = vmatprep.subr.bf16.mxu1 %v1298_v15 }
  0x6f   :  { %1158 = vmatprep.subr.bf16.mxu0 %v1291_v10 }
  0x71   :  { %1189 = vmatpush3.bf16.msra.mxu1 %v1298_v15 }
  0x72   :  { %1159 = vmatpush3.bf16.msra.mxu0 %v1291_v10  ;;  %1190 = vmatprep.subr.bf16.mxu1 %v1299_v20 }
  0x73   :  { %1160 = vmatprep.subr.bf16.mxu0 %v1292_v12 }
  0x75   :  { %1191 = vmatpush3.bf16.msra.mxu1 %v1299_v20 }
  0x76   :  { %1161 = vmatpush3.bf16.msra.mxu0 %v1292_v12  ;;  %1192 = vmatprep.subr.bf16.mxu1 %v1300_v38 }
  0x77   :  { %1162 = vmatprep.subr.bf16.mxu0 %v1293_v14 }
  0x79   :  { %1193 = vmatpush3.bf16.msra.mxu1 %v1300_v38 }
  0x7a   :  { %1163 = vmatpush3.bf16.msra.mxu0 %v1293_v14  ;;  %1194 = vmatprep.subr.bf16.mxu1 %v1301_v39 }
  0x7b   :  { %1212 = vmatprep.subr.bf16.mxu0 %v1302_v40 }
  0x7d   :  { %1165 = vmatmul.mubr.bf16.vlgmr.msra.gmra.mrb[0].mxu0 %v119_v21  ;;  %1195 = vmatpush3.bf16.msra.mxu1 %v1301_v39  ;;  %v1308_v39 = vld [vmem:[#allocation8 + $0x30] sm:$0xff]  }
  0x7e   :  { %1168 = vmatprep.mubr.bf16.mxu0 %v120_v22  ;;  %1213 = vmatpush3.bf16.msra.mxu0 %v1302_v40  ;;  %v1309_v40 = vld [vmem:[#allocation8 + $0x38] sm:$0xff]  }
  0x7f   :  { %1214 = vmatprep.subr.bf16.mxu0 %v1303_v41 }
  0x82   :  { %1215 = vmatpush3.bf16.msra.mxu0 %v1303_v41  ;;  %v1310_v41 = vld [vmem:[#allocation10] sm:$0xff]  }
  0x83   :  { %1216 = vmatprep.subr.bf16.mxu0 %v1304_v42  ;;  %1244 = vmatprep.subr.bf16.mxu1 %v1310_v41 }
  0x85   :  { %1169 = vmatmul.mubr.bf16.gmra.mrb[4].mxu0 %v121_v27 }
  0x86   :  { %1172 = vmatprep.mubr.bf16.mxu0 %v122_v28  ;;  %1217 = vmatpush3.bf16.msra.mxu0 %v1304_v42  ;;  %v1311_v42 = vld [vmem:[#allocation10 + $0x8] sm:$0xff]  }
  0x87   :  { %1218 = vmatprep.subr.bf16.mxu0 %v1305_v43 }
  0x8a   :  { %1219 = vmatpush3.bf16.msra.mxu0 %v1305_v43  ;;  %v1312_v43 = vld [vmem:[#allocation10 + $0x10] sm:$0xff]  }
  0x8b   :  { %1220 = vmatprep.subr.bf16.mxu0 %v1306_v44 }
  0x8d   :  { %1173 = vmatmul.mubr.bf16.gmra.mrb[8].mxu0 %v123_v33 }
  0x8e   :  { %1176 = vmatprep.mubr.bf16.mxu0 %v124_v34  ;;  %1221 = vmatpush3.bf16.msra.mxu0 %v1306_v44  ;;  %v1313_v44 = vld [vmem:[#allocation10 + $0x18] sm:$0xff]  }
  0x8f   :  { %1222 = vmatprep.subr.bf16.mxu0 %v1307_v45 }
  0x92   :  { %1223 = vmatpush3.bf16.msra.mxu0 %v1307_v45  ;;  %v1314_v45 = vld [vmem:[#allocation10 + $0x20] sm:$0xff]  }
  0x93   :  { %1224 = vmatprep.subr.bf16.mxu0 %v1308_v39 }
  0x95   :  { %1177 = vmatmul.mubr.bf16.gmra.mrb[12].mxu0 %v125_v37 }
  0x96   :  { %1225 = vmatpush3.bf16.msra.mxu0 %v1308_v39 }
  0x97   :  { %1226 = vmatprep.subr.bf16.mxu0 %v1309_v40 }
  0x9a   :  { %1227 = vmatpush3.bf16.msra.mxu0 %v1309_v40  ;;  %v1316_v40 = vld [vmem:[#allocation10 + $0x30] sm:$0xff]  }
 0x150   :  { %v1166_v47 = vpop.f32.mrb[0].mxu0 }
 0x151   :  { %v240_v48 = vadd.f32 %v1166_v47, %v969_v46  ;;  %v231_v49 = vpop.f32.mrb[1].mxu0  ;;  %v978_v47 = vld [vmem:[%s1621_s4] ss:$0 sm:$0xff] }
 0x152   :  { %v232_v50 = vadd.f32 %v969_v46, %v231_v49  ;;  %v1167_v51 = vpop.f32.mrb[2].mxu0 }
 0x153   :  { %v243_v52 = vadd.f32 %v1167_v51, %v969_v46  ;;  %v234_v53 = vpop.f32.mrb[3].mxu0  ;;  %v296_v55 = vmax.f32 %v240_v48, 0.0 }
 0x154   :  { %v235_v54 = vadd.f32 %v969_v46, %v234_v53  ;;  %v294_v57 = vmax.f32 %v232_v50, 0.0 }
 0x155   :  { %v297_v56 = vmax.f32 %v243_v52, 0.0 }
 0x156   :  { %v295_v58 = vmax.f32 %v235_v54, 0.0 }
 0x157   :  { %v311_v59 = vpack.c.bf16 %v297_v56, %v296_v55 }
 0x158   :  { %v1170_v60 = vpop.f32.mrb[4].mxu0  ;;  %v310_v61 = vpack.c.bf16 %v295_v58, %v294_v57 }
 0x159   :  { %v256_v62 = vadd.f32 %v1170_v60, %v969_v46  ;;  %v247_v63 = vpop.f32.mrb[5].mxu0 }
 0x15a   :  { %v248_v0 = vadd.f32 %v969_v46, %v247_v63  ;;  %v1171_v1 = vpop.f32.mrb[6].mxu0  ;;  %1196 = vmatprep.mubr.bf16.mxu1 %v310_v61 }
 0x15b   :  { %v259_v2 = vadd.f32 %v1171_v1, %v969_v46  ;;  %v250_v3 = vpop.f32.mrb[7].mxu0  ;;  %1197 = vmatmul.mubr.bf16.vlgmr.msra.gmra.mrb[0].mxu1 %v311_v59  ;;  %v300_v5 = vmax.f32 %v256_v62, 0.0 }
 0x15c   :  { %v251_v4 = vadd.f32 %v969_v46, %v250_v3  ;;  %v298_v7 = vmax.f32 %v248_v0, 0.0  ;;  %1245 = vmatpush3.bf16.msra.mxu1 %v1310_v41  ;;  %v1317_v41 = vld [vmem:[#allocation10 + $0x38] sm:$0xff]  }
 0x15d   :  { %v301_v6 = vmax.f32 %v259_v2, 0.0  ;;  %1246 = vmatprep.subr.bf16.mxu1 %v1311_v42 }
 0x15e   :  { %v299_v8 = vmax.f32 %v251_v4, 0.0 }
 0x15f   :  { %v313_v9 = vpack.c.bf16 %v301_v6, %v300_v5 }
 0x160   :  { %v312_v10 = vpack.c.bf16 %v299_v8, %v298_v7  ;;  %v1174_v11 = vpop.f32.mrb[8].mxu0  ;;  %1247 = vmatpush3.bf16.msra.mxu1 %v1311_v42  ;;  %v987_v42 = vld [vmem:[%s1623_s6] ss:$0 sm:$0xff] }
 0x161   :  { %v272_v12 = vadd.f32 %v1174_v11, %v969_v46  ;;  %v263_v13 = vpop.f32.mrb[9].mxu0  ;;  %1248 = vmatprep.subr.bf16.mxu1 %v1312_v43 }
 0x162   :  { %v264_v14 = vadd.f32 %v969_v46, %v263_v13  ;;  %v1175_v15 = vpop.f32.mrb[10].mxu0  ;;  %1200 = vmatprep.mubr.bf16.mxu1 %v312_v10 }
 0x163   :  { %v275_v16 = vadd.f32 %v1175_v15, %v969_v46  ;;  %v266_v17 = vpop.f32.mrb[11].mxu0  ;;  %1201 = vmatmul.mubr.bf16.gmra.mrb[4].mxu1 %v313_v9  ;;  %v304_v19 = vmax.f32 %v272_v12, 0.0 }
 0x164   :  { %v267_v18 = vadd.f32 %v969_v46, %v266_v17  ;;  %v302_v21 = vmax.f32 %v264_v14, 0.0  ;;  %1249 = vmatpush3.bf16.msra.mxu1 %v1312_v43 }
 0x165   :  { %v305_v20 = vmax.f32 %v275_v16, 0.0  ;;  %1250 = vmatprep.subr.bf16.mxu1 %v1313_v44 }
 0x166   :  { %v303_v22 = vmax.f32 %v267_v18, 0.0 }
 0x167   :  { %v315_v23 = vpack.c.bf16 %v305_v20, %v304_v19 }
 0x168   :  { %v314_v24 = vpack.c.bf16 %v303_v22, %v302_v21  ;;  %v1178_v25 = vpop.f32.mrb[12].mxu0  ;;  %1251 = vmatpush3.bf16.msra.mxu1 %v1313_v44 }
 0x169   :  { %v288_v26 = vadd.f32 %v1178_v25, %v969_v46  ;;  %v279_v27 = vpop.f32.mrb[13].mxu0  ;;  %1252 = vmatprep.subr.bf16.mxu1 %v1314_v45 }
 0x16a   :  { %v280_v28 = vadd.f32 %v969_v46, %v279_v27  ;;  %v1179_v29 = vpop.f32.mrb[14].mxu0  ;;  %1204 = vmatprep.mubr.bf16.mxu1 %v314_v24 }
 0x16b   :  { %v291_v30 = vadd.f32 %v1179_v29, %v969_v46  ;;  %v282_v31 = vpop.f32.mrb[15].mxu0  ;;  %1205 = vmatmul.mubr.bf16.gmra.mrb[8].mxu1 %v315_v23  ;;  %v308_v33 = vmax.f32 %v288_v26, 0.0 }
 0x16c   :  { %v283_v32 = vadd.f32 %v969_v46, %v282_v31  ;;  %v306_v35 = vmax.f32 %v280_v28, 0.0  ;;  %v1315_v46 = vld [vmem:[#allocation10 + $0x28] sm:$0xff]   ;;  %1253 = vmatpush3.bf16.msra.mxu1 %v1314_v45 }
 0x16d   :  { %v309_v34 = vmax.f32 %v291_v30, 0.0  ;;  %1254 = vmatprep.subr.bf16.mxu1 %v1315_v46 }
 0x16e   :  { %v307_v36 = vmax.f32 %v283_v32, 0.0 }
 0x16f   :  { %v317_v37 = vpack.c.bf16 %v309_v34, %v308_v33 }
 0x170   :  { %v316_v38 = vpack.c.bf16 %v307_v36, %v306_v35  ;;  %1255 = vmatpush3.bf16.msra.mxu1 %v1315_v46 }
 0x171   :  { %1256 = vmatprep.subr.bf16.mxu1 %v1316_v40 }
 0x172   :  { %1208 = vmatprep.mubr.bf16.mxu1 %v316_v38 }
 0x173   :  { %1209 = vmatmul.mubr.bf16.gmra.mrb[12].mxu1 %v317_v37 }
 0x174   :  { %1257 = vmatpush3.bf16.msra.mxu1 %v1316_v40 }
 0x175   :  { %1258 = vmatprep.subr.bf16.mxu1 %v1317_v41 }
 0x178   :  { %1259 = vmatpush3.bf16.msra.mxu1 %v1317_v41 }
 0x22e   :  { %v1198_v48 = vpop.f32.mrb[0].mxu1 }
 0x22f   :  { %v432_v49 = vadd.f32 %v1198_v48, %v978_v47  ;;  %v423_v50 = vpop.f32.mrb[1].mxu1 }
 0x230   :  { %v424_v51 = vadd.f32 %v978_v47, %v423_v50  ;;  %v1199_v52 = vpop.f32.mrb[2].mxu1 }
 0x231   :  { %v435_v53 = vadd.f32 %v1199_v52, %v978_v47  ;;  %v426_v54 = vpop.f32.mrb[3].mxu1  ;;  %v488_v56 = vmax.f32 %v432_v49, 0.0 }
 0x232   :  { %v427_v55 = vadd.f32 %v978_v47, %v426_v54  ;;  %v486_v58 = vmax.f32 %v424_v51, 0.0 }
 0x233   :  { %v489_v57 = vmax.f32 %v435_v53, 0.0 }
 0x234   :  { %v487_v59 = vmax.f32 %v427_v55, 0.0 }
 0x235   :  { %v503_v60 = vpack.c.bf16 %v489_v57, %v488_v56 }
 0x236   :  { %v502_v61 = vpack.c.bf16 %v487_v59, %v486_v58  ;;  %v1202_v62 = vpop.f32.mrb[4].mxu1 }
 0x237   :  { %v448_v63 = vadd.f32 %v1202_v62, %v978_v47  ;;  %v439_v0 = vpop.f32.mrb[5].mxu1 }
 0x238   :  { %v440_v1 = vadd.f32 %v978_v47, %v439_v0  ;;  %v1203_v2 = vpop.f32.mrb[6].mxu1  ;;  %1228 = vmatprep.mubr.bf16.mxu0 %v502_v61 }
 0x239   :  { %v451_v3 = vadd.f32 %v1203_v2, %v978_v47  ;;  %v442_v4 = vpop.f32.mrb[7].mxu1  ;;  %1229 = vmatmul.mubr.bf16.vlgmr.msra.gmra.mrb[16].mxu0 %v503_v60  ;;  %v492_v6 = vmax.f32 %v448_v63, 0.0 }
 0x23a   :  { %v443_v5 = vadd.f32 %v978_v47, %v442_v4  ;;  %v490_v8 = vmax.f32 %v440_v1, 0.0 }
 0x23b   :  { %v493_v7 = vmax.f32 %v451_v3, 0.0 }
 0x23c   :  { %v491_v9 = vmax.f32 %v443_v5, 0.0 }
 0x23d   :  { %v505_v10 = vpack.c.bf16 %v493_v7, %v492_v6 }
 0x23e   :  { %v504_v11 = vpack.c.bf16 %v491_v9, %v490_v8  ;;  %v1206_v12 = vpop.f32.mrb[8].mxu1 }
 0x23f   :  { %v464_v13 = vadd.f32 %v1206_v12, %v978_v47  ;;  %v455_v14 = vpop.f32.mrb[9].mxu1 }
 0x240   :  { %v456_v15 = vadd.f32 %v978_v47, %v455_v14  ;;  %v1207_v16 = vpop.f32.mrb[10].mxu1  ;;  %1232 = vmatprep.mubr.bf16.mxu0 %v504_v11 }
 0x241   :  { %v467_v17 = vadd.f32 %v1207_v16, %v978_v47  ;;  %v458_v18 = vpop.f32.mrb[11].mxu1  ;;  %1233 = vmatmul.mubr.bf16.gmra.mrb[20].mxu0 %v505_v10  ;;  %v496_v20 = vmax.f32 %v464_v13, 0.0 }
 0x242   :  { %v459_v19 = vadd.f32 %v978_v47, %v458_v18  ;;  %v494_v22 = vmax.f32 %v456_v15, 0.0 }
 0x243   :  { %v497_v21 = vmax.f32 %v467_v17, 0.0 }
 0x244   :  { %v495_v23 = vmax.f32 %v459_v19, 0.0 }
 0x245   :  { %v507_v24 = vpack.c.bf16 %v497_v21, %v496_v20 }
 0x246   :  { %v506_v25 = vpack.c.bf16 %v495_v23, %v494_v22  ;;  %v1210_v26 = vpop.f32.mrb[12].mxu1 }
 0x247   :  { %v480_v27 = vadd.f32 %v1210_v26, %v978_v47  ;;  %v471_v28 = vpop.f32.mrb[13].mxu1 }
 0x248   :  { %v472_v29 = vadd.f32 %v978_v47, %v471_v28  ;;  %v1211_v30 = vpop.f32.mrb[14].mxu1  ;;  %1236 = vmatprep.mubr.bf16.mxu0 %v506_v25 }
 0x249   :  { %v483_v31 = vadd.f32 %v1211_v30, %v978_v47  ;;  %v474_v32 = vpop.f32.mrb[15].mxu1  ;;  %1237 = vmatmul.mubr.bf16.gmra.mrb[24].mxu0 %v507_v24  ;;  %v500_v34 = vmax.f32 %v480_v27, 0.0 }
 0x24a   :  { %v475_v33 = vadd.f32 %v978_v47, %v474_v32  ;;  %v498_v36 = vmax.f32 %v472_v29, 0.0 }
 0x24b   :  { %v501_v35 = vmax.f32 %v483_v31, 0.0 }
 0x24c   :  { %v499_v37 = vmax.f32 %v475_v33, 0.0 }
 0x24d   :  { %v509_v38 = vpack.c.bf16 %v501_v35, %v500_v34 }
 0x24e   :  { %v508_v39 = vpack.c.bf16 %v499_v37, %v498_v36  ;;  %v996_v36 = vld [vmem:[%s1625_s8] ss:$0 sm:$0xff] }
 0x250   :  { %1240 = vmatprep.mubr.bf16.mxu0 %v508_v39 }
 0x251   :  { %1241 = vmatmul.mubr.bf16.gmra.mrb[28].mxu0 %v509_v38 }
 0x30c   :  { %v1230_v43 = vpop.f32.mrb[16].mxu0 }
 0x30d   :  { %v624_v44 = vadd.f32 %v1230_v43, %v987_v42  ;;  %v615_v45 = vpop.f32.mrb[17].mxu0 }
 0x30e   :  { %v616_v46 = vadd.f32 %v987_v42, %v615_v45  ;;  %v1231_v47 = vpop.f32.mrb[18].mxu0 }
 0x30f   :  { %v627_v48 = vadd.f32 %v1231_v47, %v987_v42  ;;  %v618_v49 = vpop.f32.mrb[19].mxu0  ;;  %v680_v51 = vmax.f32 %v624_v44, 0.0 }
 0x310   :  { %v619_v50 = vadd.f32 %v987_v42, %v618_v49  ;;  %v678_v53 = vmax.f32 %v616_v46, 0.0 }
 0x311   :  { %v681_v52 = vmax.f32 %v627_v48, 0.0 }
 0x312   :  { %v679_v54 = vmax.f32 %v619_v50, 0.0 }
 0x313   :  { %v695_v55 = vpack.c.bf16 %v681_v52, %v680_v51 }
 0x314   :  { %v694_v56 = vpack.c.bf16 %v679_v54, %v678_v53  ;;  %v1234_v57 = vpop.f32.mrb[20].mxu0 }
 0x315   :  { %v640_v58 = vadd.f32 %v1234_v57, %v987_v42  ;;  %v631_v59 = vpop.f32.mrb[21].mxu0 }
 0x316   :  { %v632_v60 = vadd.f32 %v987_v42, %v631_v59  ;;  %v1235_v61 = vpop.f32.mrb[22].mxu0  ;;  %1260 = vmatprep.mubr.bf16.mxu1 %v694_v56 }
 0x317   :  { %v643_v62 = vadd.f32 %v1235_v61, %v987_v42  ;;  %v634_v63 = vpop.f32.mrb[23].mxu0  ;;  %1261 = vmatmul.mubr.bf16.vlgmr.msra.gmra.mrb[16].mxu1 %v695_v55  ;;  %v684_v1 = vmax.f32 %v640_v58, 0.0 }
 0x318   :  { %v635_v0 = vadd.f32 %v987_v42, %v634_v63  ;;  %v682_v3 = vmax.f32 %v632_v60, 0.0 }
 0x319   :  { %v685_v2 = vmax.f32 %v643_v62, 0.0 }
 0x31a   :  { %v683_v4 = vmax.f32 %v635_v0, 0.0 }
 0x31b   :  { %v697_v5 = vpack.c.bf16 %v685_v2, %v684_v1 }
 0x31c   :  { %v696_v6 = vpack.c.bf16 %v683_v4, %v682_v3  ;;  %v1238_v7 = vpop.f32.mrb[24].mxu0 }
 0x31d   :  { %v656_v8 = vadd.f32 %v1238_v7, %v987_v42  ;;  %v647_v9 = vpop.f32.mrb[25].mxu0 }
 0x31e   :  { %v648_v10 = vadd.f32 %v987_v42, %v647_v9  ;;  %v1239_v11 = vpop.f32.mrb[26].mxu0  ;;  %1264 = vmatprep.mubr.bf16.mxu1 %v696_v6 }
 0x31f   :  { %v659_v12 = vadd.f32 %v1239_v11, %v987_v42  ;;  %v650_v13 = vpop.f32.mrb[27].mxu0  ;;  %1265 = vmatmul.mubr.bf16.gmra.mrb[20].mxu1 %v697_v5  ;;  %v688_v15 = vmax.f32 %v656_v8, 0.0 }
 0x320   :  { %v651_v14 = vadd.f32 %v987_v42, %v650_v13  ;;  %v686_v17 = vmax.f32 %v648_v10, 0.0 }
 0x321   :  { %v689_v16 = vmax.f32 %v659_v12, 0.0 }
 0x322   :  { %v687_v18 = vmax.f32 %v651_v14, 0.0 }
 0x323   :  { %v699_v19 = vpack.c.bf16 %v689_v16, %v688_v15 }
 0x324   :  { %v698_v20 = vpack.c.bf16 %v687_v18, %v686_v17  ;;  %v1242_v21 = vpop.f32.mrb[28].mxu0 }
 0x325   :  { %v672_v22 = vadd.f32 %v1242_v21, %v987_v42  ;;  %v663_v23 = vpop.f32.mrb[29].mxu0 }
 0x326   :  { %v664_v24 = vadd.f32 %v987_v42, %v663_v23  ;;  %v1243_v25 = vpop.f32.mrb[30].mxu0  ;;  %1268 = vmatprep.mubr.bf16.mxu1 %v698_v20 }
 0x327   :  { %v675_v26 = vadd.f32 %v1243_v25, %v987_v42  ;;  %v666_v27 = vpop.f32.mrb[31].mxu0  ;;  %1269 = vmatmul.mubr.bf16.gmra.mrb[24].mxu1 %v699_v19  ;;  %v692_v29 = vmax.f32 %v672_v22, 0.0 }
 0x328   :  { %v667_v28 = vadd.f32 %v987_v42, %v666_v27  ;;  %v690_v31 = vmax.f32 %v664_v24, 0.0 }
 0x329   :  { %v693_v30 = vmax.f32 %v675_v26, 0.0 }
 0x32a   :  { %v691_v32 = vmax.f32 %v667_v28, 0.0 }
 0x32b   :  { %v701_v33 = vpack.c.bf16 %v693_v30, %v692_v29 }
 0x32c   :  { %v700_v34 = vpack.c.bf16 %v691_v32, %v690_v31 }
 0x32e   :  { %1272 = vmatprep.mubr.bf16.mxu1 %v700_v34 }
 0x32f   :  { %1273 = vmatmul.mubr.bf16.gmra.mrb[28].mxu1 %v701_v33 }
 0x3ea   :  { %v1262_v35 = vpop.f32.mrb[16].mxu1 }
 0x3eb   :  { %v807_v37 = vpop.f32.mrb[17].mxu1  ;;  %v816_v39 = vadd.f32 %v1262_v35, %v996_v36 }
 0x3ec   :  { %v1263_v38 = vpop.f32.mrb[18].mxu1  ;;  %v808_v43 = vadd.f32 %v996_v36, %v807_v37 }
 0x3ed   :  { %v819_v40 = vadd.f32 %v1263_v38, %v996_v36  ;;  %v810_v41 = vpop.f32.mrb[19].mxu1 }
 0x3ee   :  { %v811_v42 = vadd.f32 %v996_v36, %v810_v41 }
 0x3ef   :  { %v1045_v44 = vpack.c.bf16 %v819_v40, %v816_v39 }
 0x3f0   :  { %v1040_v45 = vpack.c.bf16 %v811_v42, %v808_v43 }
 0x3f1   :  { %1077 = vst [vmem:[#allocation11 + $0x8] sm:$0xff] %v1045_v44  }
 0x3f2   :  { %1041 = vst [vmem:[#allocation11] sm:$0xff] %v1040_v45   ;;  %v1266_v46 = vpop.f32.mrb[20].mxu1 }
 0x3f3   :  { %v823_v47 = vpop.f32.mrb[21].mxu1  ;;  %v832_v49 = vadd.f32 %v1266_v46, %v996_v36 }
 0x3f4   :  { %v1267_v48 = vpop.f32.mrb[22].mxu1  ;;  %v824_v52 = vadd.f32 %v996_v36, %v823_v47 }
 0x3f5   :  { %v835_v50 = vadd.f32 %v1267_v48, %v996_v36  ;;  %v826_v51 = vpop.f32.mrb[23].mxu1 }
 0x3f6   :  { %v827_v53 = vadd.f32 %v996_v36, %v826_v51 }
 0x3f7   :  { %v1055_v54 = vpack.c.bf16 %v835_v50, %v832_v49 }
 0x3f8   :  { %v1050_v55 = vpack.c.bf16 %v827_v53, %v824_v52 }
 0x3f9   :  { %1079 = vst [vmem:[#allocation11 + $0x18] sm:$0xff] %v1055_v54  }
 0x3fa   :  { %1078 = vst [vmem:[#allocation11 + $0x10] sm:$0xff] %v1050_v55   ;;  %v1270_v56 = vpop.f32.mrb[24].mxu1 }
 0x3fb   :  { %v839_v57 = vpop.f32.mrb[25].mxu1  ;;  %v848_v59 = vadd.f32 %v1270_v56, %v996_v36 }
 0x3fc   :  { %v1271_v58 = vpop.f32.mrb[26].mxu1  ;;  %v840_v62 = vadd.f32 %v996_v36, %v839_v57 }
 0x3fd   :  { %v851_v60 = vadd.f32 %v1271_v58, %v996_v36  ;;  %v842_v61 = vpop.f32.mrb[27].mxu1 }
 0x3fe   :  { %v843_v63 = vadd.f32 %v996_v36, %v842_v61 }
 0x3ff   :  { %v1065_v0 = vpack.c.bf16 %v851_v60, %v848_v59 }
 0x400   :  { %v1060_v1 = vpack.c.bf16 %v843_v63, %v840_v62 }
 0x401   :  { %1081 = vst [vmem:[#allocation11 + $0x28] sm:$0xff] %v1065_v0  }
 0x402   :  { %1080 = vst [vmem:[#allocation11 + $0x20] sm:$0xff] %v1060_v1   ;;  %v1274_v2 = vpop.f32.mrb[28].mxu1 }
 0x403   :  { %v855_v3 = vpop.f32.mrb[29].mxu1  ;;  %v864_v5 = vadd.f32 %v1274_v2, %v996_v36 }
 0x404   :  { %v1275_v4 = vpop.f32.mrb[30].mxu1  ;;  %v856_v8 = vadd.f32 %v996_v36, %v855_v3 }
 0x405   :  { %v867_v6 = vadd.f32 %v1275_v4, %v996_v36  ;;  %v858_v7 = vpop.f32.mrb[31].mxu1 }
 0x406   :  { %v859_v9 = vadd.f32 %v996_v36, %v858_v7 }
 0x407   :  { %v1075_v10 = vpack.c.bf16 %v867_v6, %v864_v5 }
 0x408   :  { %v1070_v11 = vpack.c.bf16 %v859_v9, %v856_v8 }
 0x409   :  { %1083 = vst [vmem:[#allocation11 + $0x38] sm:$0xff] %v1075_v10  }
 0x40a   :  { %1082 = vst [vmem:[#allocation11 + $0x30] sm:$0xff] %v1070_v11  }
 0x40b   :  { %954 = vsyncadd [#allocation4], 704  ;;  %s1467_s8 = smov [#allocation11]  }
 0x40c   :  { %s955_s10 = sshll.u32 %s1467_s8, 4  ;;  %s956_s10 = int_to_ptr.vmem [resolvable:$true] %s955_s10 }
 0x40d   :  { %s1428_s14 = scalar_lea.vmem %s956_s10, 320  ;;  %s1432_s15 = scalar_lea.vmem %s956_s10, 1024 }
 0x40e   :  { %p1429_p12 = scmp.ne.s32.totalorder %s956_s10, %s1428_s14  ;;  %p1433_p13 = scmp.lt.s32.totalorder %s956_s10, %s956_s10 }
 0x40f   :  { %p1434_p0 = scmp.lt.s32.totalorder %s1432_s15, %s1428_s14 }
 0x411   :  { %p1435_p1 = por %p1434_p0, %p1433_p13 }
 0x413   :  { %p1436_p2 = pnand %p1435_p1, %p1429_p12 }
 0x415   :  { %1439 = shalt.err (!%p1436_p2)
}
 0x416   :  { %s1440_s18 = scalar_lea.hbm %s1626_s9, 320 }
 0x417   :  { %p1441_p3 = scmp.ne.s32.totalorder %s1626_s9, %s1440_s18  ;;  %p1444_p4 = scmp.lt.u32.totalorder %s1440_s18, %s1626_s9 }
 0x419   :  { %p1446_p5 = pnand %p1444_p4, %p1441_p3 }
 0x41b   :  { %1449 = shalt.err (!%p1446_p5)
}
 0x41c   :  { %961 = dma.vmem_to_hbm [thread:$0]  %s956_s10, 320, %s1626_s9, [#allocation4], %s1459_s19, %s1459_s19, %s1460_s20  }
 0x41d   :  { %1456 = dma.done.wait [#allocation4], 1024  }
 0x41e   :  { %1457 = vsyncadd [#allocation4], 4294966272 }
 0x41f   :  { %965 = vsyncpa [#allocation3], 1 }
 0x420   :  { %966 = vsyncpa [#allocation6], 1 }
 0x421   :  { %967 = vsyncpa [#allocation9], 1 }
 0x422   :  { %968 = vsyncpa [#allocation4], 1 }

</bundles_post_ra>
